<compile_context>
chip_gen: v7x
topology: tpu7x:2x2x1
jax: 0.10.0
libtpu: 0.0.40
codegen_flags: <defaults>
</compile_context>

<pallas_src>
import jax
import jax.numpy as jnp
from jax import lax
from jax.experimental import pallas as pl
from jax.experimental.pallas import tpu as pltpu

SEQ = 8
BATCH = 2
HIDDEN = 32
INPUT_SIZE = 1


def rnn_kernel(x_ref, h0_ref, wih_ref, whh_t_ref, b_ref, wout_col_ref, bout_ref,
               pred_ref, hn_ref):
    # x_ref:        (S*B, 1)  flattened input sequence (seq-major, like torch default)
    # h0_ref:       (B, H)    initial hidden
    # wih_ref:      (1, H)    W_ih as a row (input_size == 1)
    # whh_t_ref:    (H, H)    W_hh^T (transposed in the wrapper, not per step)
    # b_ref:        (1, H)    b_ih + b_hh
    # wout_col_ref: (H, 1)    output Linear weight as a column
    # bout_ref:     (1, 1)    output Linear bias (SMEM scalar)
    # pred_ref:     (S*B, 1)  flattened predictions (reshaped in the wrapper)
    # hn_ref:       (B, H)    final hidden state
    SB = x_ref.shape[0]
    B, H = h0_ref.shape
    S = SB // B

    wih = wih_ref[...]            # (1, H)
    bias = b_ref[...]             # (1, H)
    whh_t = whh_t_ref[...]        # (H, H)
    wout_col = wout_col_ref[...]  # (H, 1)
    bout = bout_ref[0, 0]         # scalar (SMEM)

    # Loop-invariant input projection + bias, computed once outside the recurrence.
    # (S*B, 1) * (1, H) + (1, H) -> (S*B, H)
    xproj = x_ref[...] * wih + bias

    # Fully unrolled, strictly serial recurrence; hidden states stay in vregs.
    h = h0_ref[...]                                # (B, H)
    hs = []
    for t in range(S):
        pre = xproj[t * B:(t + 1) * B, :] + jnp.dot(
            h, whh_t, preferred_element_type=jnp.float32)
        h = jnp.tanh(pre)                          # (B, H)
        hs.append(h)

    # Register-resident hidden stack -> one batched output matmul + one store.
    h_all = jnp.concatenate(hs, axis=0)            # (S*B, H), ~2 vregs
    pred = jnp.dot(h_all, wout_col, preferred_element_type=jnp.float32) + bout
    pred_ref[...] = pred.astype(pred_ref.dtype)    # (S*B, 1)
    hn_ref[...] = h.astype(hn_ref.dtype)           # (B, H)


def rnn_forward(x, h0, w_ih, w_hh, b_ih, b_hh, w_out, b_out):
    S, B, _ = x.shape
    H = w_hh.shape[0]

    x_flat = x.reshape(S * B, 1)        # flatten to clean 2D (sublane, lane) tile
    h0_2d = h0.reshape(B, H)
    wih_row = w_ih.reshape(1, H)        # (H, 1) -> (1, H)
    whh_t = w_hh.T                      # hoist the transpose out of the kernel
    bias = (b_ih + b_hh).reshape(1, H)
    wout_col = w_out.reshape(H, 1)      # Linear(32, 1) weight as a column
    bout = b_out.reshape(1, 1)

    # Advisory cost hint: the kernel is tiny; keep XLA from serializing around it.
    flops = 2 * S * B * H * H + 2 * S * B * H
    transcendentals = S * B * H
    bytes_accessed = 4 * (S * B + B * H + H + H * H + H + H + 1 + S * B + B * H)
    cost = pl.CostEstimate(flops=flops, transcendentals=transcendentals,
                           bytes_accessed=bytes_accessed)

    pred_flat, hn_2d = pl.pallas_call(
        rnn_kernel,
        out_shape=(
            jax.ShapeDtypeStruct((S * B, 1), x.dtype),
            jax.ShapeDtypeStruct((B, H), x.dtype),
        ),
        in_specs=[
            pl.BlockSpec(memory_space=pltpu.MemorySpace.VMEM),  # x (S*B, 1)
            pl.BlockSpec(memory_space=pltpu.MemorySpace.VMEM),  # h0 (B, H)
            pl.BlockSpec(memory_space=pltpu.MemorySpace.VMEM),  # W_ih row
            pl.BlockSpec(memory_space=pltpu.MemorySpace.VMEM),  # W_hh^T
            pl.BlockSpec(memory_space=pltpu.MemorySpace.VMEM),  # bias
            pl.BlockSpec(memory_space=pltpu.MemorySpace.VMEM),  # W_out column
            pl.BlockSpec(memory_space=pltpu.MemorySpace.SMEM),  # b_out scalar
        ],
        out_specs=(
            pl.BlockSpec(memory_space=pltpu.MemorySpace.VMEM),
            pl.BlockSpec(memory_space=pltpu.MemorySpace.VMEM),
        ),
        cost_estimate=cost,
    )(x_flat, h0_2d, wih_row, whh_t, bias, wout_col, bout)

    return pred_flat.reshape(S, B, 1), hn_2d[None]


def rnn_reference(x, h0, w_ih, w_hh, b_ih, b_hh, w_out, b_out):
    # pure-JAX reference matching torch nn.RNN + nn.Linear semantics
    def step(h, x_t):
        h_new = jnp.tanh(x_t @ w_ih.T + b_ih + h @ w_hh.T + b_hh)
        return h_new, h_new
    h_last, outs = lax.scan(step, h0[0], x)
    pred = outs @ w_out.T + b_out
    return pred, h_last[None]


if __name__ == "__main__":
    key = jax.random.PRNGKey(0)
    ks = jax.random.split(key, 8)
    bound = 1.0 / jnp.sqrt(HIDDEN)

    # deterministic parameter init (same shapes as torch nn.RNN / nn.Linear)
    w_ih = jax.random.uniform(ks[0], (HIDDEN, INPUT_SIZE), jnp.float32, -bound, bound)
    w_hh = jax.random.uniform(ks[1], (HIDDEN, HIDDEN), jnp.float32, -bound, bound)
    b_ih = jax.random.uniform(ks[2], (HIDDEN,), jnp.float32, -bound, bound)
    b_hh = jax.random.uniform(ks[3], (HIDDEN,), jnp.float32, -bound, bound)
    w_out = jax.random.uniform(ks[4], (1, HIDDEN), jnp.float32, -bound, bound)
    b_out = jax.random.uniform(ks[5], (1,), jnp.float32, -bound, bound)

    x = jax.random.normal(ks[6], (SEQ, BATCH, INPUT_SIZE), jnp.float32)
    h0 = jax.random.normal(ks[7], (1, BATCH, HIDDEN), jnp.float32)

    pred, hn = rnn_forward(x, h0, w_ih, w_hh, b_ih, b_hh, w_out, b_out)
    jax.block_until_ready((pred, hn))

    pred_ref, hn_ref = rnn_reference(x, h0, w_ih, w_hh, b_ih, b_hh, w_out, b_out)
    assert pred.shape == (SEQ, BATCH, 1) and hn.shape == (1, BATCH, HIDDEN)
    assert jnp.allclose(pred, pred_ref, atol=1e-5, rtol=1e-5)
    assert jnp.allclose(hn, hn_ref, atol=1e-5, rtol=1e-5)

    print("KERNEL_OK")
</pallas_src>

<mosaic_0001>
module attributes {stable_mosaic.version = 11 : i64} {
  func.func @rnn_kernel(%arg0: memref<16x1xf32, #tpu.memory_space<vmem>>, %arg1: memref<2x32xf32, #tpu.memory_space<vmem>>, %arg2: memref<1x32xf32, #tpu.memory_space<vmem>>, %arg3: memref<32x32xf32, #tpu.memory_space<vmem>>, %arg4: memref<1x32xf32, #tpu.memory_space<vmem>>, %arg5: memref<32x1xf32, #tpu.memory_space<vmem>>, %arg6: memref<1x1xf32, #tpu.memory_space<smem>>, %arg7: memref<16x1xf32, #tpu.memory_space<vmem>>, %arg8: memref<2x32xf32, #tpu.memory_space<vmem>>) attributes {dimension_semantics = [], scalar_prefetch = 0 : i64, scratch_operands = 0 : i64, tpu.core_type = #tpu.core_type<tc>} {
    %c0 = arith.constant 0 : index
    %c0_0 = arith.constant 0 : index
    %0 = vector.load %arg2[%c0, %c0_0] : memref<1x32xf32, #tpu.memory_space<vmem>>, vector<1x32xf32>
    %c0_1 = arith.constant 0 : index
    %c0_2 = arith.constant 0 : index
    %1 = vector.load %arg4[%c0_1, %c0_2] : memref<1x32xf32, #tpu.memory_space<vmem>>, vector<1x32xf32>
    %c0_3 = arith.constant 0 : index
    %c0_4 = arith.constant 0 : index
    %2 = vector.load %arg3[%c0_3, %c0_4] : memref<32x32xf32, #tpu.memory_space<vmem>>, vector<32x32xf32>
    %c0_5 = arith.constant 0 : index
    %c0_6 = arith.constant 0 : index
    %3 = vector.load %arg5[%c0_5, %c0_6] : memref<32x1xf32, #tpu.memory_space<vmem>>, vector<32x1xf32>
    %c0_7 = arith.constant 0 : index
    %c0_8 = arith.constant 0 : index
    %4 = memref.load %arg6[%c0_7, %c0_8] : memref<1x1xf32, #tpu.memory_space<smem>>
    %c0_9 = arith.constant 0 : index
    %c0_10 = arith.constant 0 : index
    %5 = vector.load %arg0[%c0_9, %c0_10] : memref<16x1xf32, #tpu.memory_space<vmem>>, vector<16x1xf32>
    %6 = vector.broadcast %5 : vector<16x1xf32> to vector<16x32xf32>
    %7 = vector.broadcast %0 : vector<1x32xf32> to vector<16x32xf32>
    %8 = arith.mulf %6, %7 : vector<16x32xf32>
    %9 = vector.broadcast %1 : vector<1x32xf32> to vector<16x32xf32>
    %10 = arith.addf %8, %9 : vector<16x32xf32>
    %c0_11 = arith.constant 0 : index
    %c0_12 = arith.constant 0 : index
    %11 = vector.load %arg1[%c0_11, %c0_12] : memref<2x32xf32, #tpu.memory_space<vmem>>, vector<2x32xf32>
    %12 = vector.extract_strided_slice %10 {offsets = [0, 0], sizes = [2, 32], strides = [1, 1]} : vector<16x32xf32> to vector<2x32xf32>
    %cst = arith.constant dense<0.000000e+00> : vector<2x32xf32>
    %13 = tpu.matmul %11, %2, %cst {dimension_numbers = #tpu.dot_dimension_numbers<[1], [0], [0], [1], [0, 0, 1, 1], [], []>} : vector<2x32xf32>, vector<32x32xf32>, vector<2x32xf32> -> vector<2x32xf32>
    %14 = arith.addf %12, %13 : vector<2x32xf32>
    %15 = math.tanh %14 : vector<2x32xf32>
    %16 = vector.extract_strided_slice %10 {offsets = [2, 0], sizes = [2, 32], strides = [1, 1]} : vector<16x32xf32> to vector<2x32xf32>
    %cst_13 = arith.constant dense<0.000000e+00> : vector<2x32xf32>
    %17 = tpu.matmul %15, %2, %cst_13 {dimension_numbers = #tpu.dot_dimension_numbers<[1], [0], [0], [1], [0, 0, 1, 1], [], []>} : vector<2x32xf32>, vector<32x32xf32>, vector<2x32xf32> -> vector<2x32xf32>
    %18 = arith.addf %16, %17 : vector<2x32xf32>
    %19 = math.tanh %18 : vector<2x32xf32>
    %20 = vector.extract_strided_slice %10 {offsets = [4, 0], sizes = [2, 32], strides = [1, 1]} : vector<16x32xf32> to vector<2x32xf32>
    %cst_14 = arith.constant dense<0.000000e+00> : vector<2x32xf32>
    %21 = tpu.matmul %19, %2, %cst_14 {dimension_numbers = #tpu.dot_dimension_numbers<[1], [0], [0], [1], [0, 0, 1, 1], [], []>} : vector<2x32xf32>, vector<32x32xf32>, vector<2x32xf32> -> vector<2x32xf32>
    %22 = arith.addf %20, %21 : vector<2x32xf32>
    %23 = math.tanh %22 : vector<2x32xf32>
    %24 = vector.extract_strided_slice %10 {offsets = [6, 0], sizes = [2, 32], strides = [1, 1]} : vector<16x32xf32> to vector<2x32xf32>
    %cst_15 = arith.constant dense<0.000000e+00> : vector<2x32xf32>
    %25 = tpu.matmul %23, %2, %cst_15 {dimension_numbers = #tpu.dot_dimension_numbers<[1], [0], [0], [1], [0, 0, 1, 1], [], []>} : vector<2x32xf32>, vector<32x32xf32>, vector<2x32xf32> -> vector<2x32xf32>
    %26 = arith.addf %24, %25 : vector<2x32xf32>
    %27 = math.tanh %26 : vector<2x32xf32>
    %28 = vector.extract_strided_slice %10 {offsets = [8, 0], sizes = [2, 32], strides = [1, 1]} : vector<16x32xf32> to vector<2x32xf32>
    %cst_16 = arith.constant dense<0.000000e+00> : vector<2x32xf32>
    %29 = tpu.matmul %27, %2, %cst_16 {dimension_numbers = #tpu.dot_dimension_numbers<[1], [0], [0], [1], [0, 0, 1, 1], [], []>} : vector<2x32xf32>, vector<32x32xf32>, vector<2x32xf32> -> vector<2x32xf32>
    %30 = arith.addf %28, %29 : vector<2x32xf32>
    %31 = math.tanh %30 : vector<2x32xf32>
    %32 = vector.extract_strided_slice %10 {offsets = [10, 0], sizes = [2, 32], strides = [1, 1]} : vector<16x32xf32> to vector<2x32xf32>
    %cst_17 = arith.constant dense<0.000000e+00> : vector<2x32xf32>
    %33 = tpu.matmul %31, %2, %cst_17 {dimension_numbers = #tpu.dot_dimension_numbers<[1], [0], [0], [1], [0, 0, 1, 1], [], []>} : vector<2x32xf32>, vector<32x32xf32>, vector<2x32xf32> -> vector<2x32xf32>
    %34 = arith.addf %32, %33 : vector<2x32xf32>
    %35 = math.tanh %34 : vector<2x32xf32>
    %36 = vector.extract_strided_slice %10 {offsets = [12, 0], sizes = [2, 32], strides = [1, 1]} : vector<16x32xf32> to vector<2x32xf32>
    %cst_18 = arith.constant dense<0.000000e+00> : vector<2x32xf32>
    %37 = tpu.matmul %35, %2, %cst_18 {dimension_numbers = #tpu.dot_dimension_numbers<[1], [0], [0], [1], [0, 0, 1, 1], [], []>} : vector<2x32xf32>, vector<32x32xf32>, vector<2x32xf32> -> vector<2x32xf32>
    %38 = arith.addf %36, %37 : vector<2x32xf32>
    %39 = math.tanh %38 : vector<2x32xf32>
    %40 = vector.extract_strided_slice %10 {offsets = [14, 0], sizes = [2, 32], strides = [1, 1]} : vector<16x32xf32> to vector<2x32xf32>
    %cst_19 = arith.constant dense<0.000000e+00> : vector<2x32xf32>
    %41 = tpu.matmul %39, %2, %cst_19 {dimension_numbers = #tpu.dot_dimension_numbers<[1], [0], [0], [1], [0, 0, 1, 1], [], []>} : vector<2x32xf32>, vector<32x32xf32>, vector<2x32xf32> -> vector<2x32xf32>
    %42 = arith.addf %40, %41 : vector<2x32xf32>
    %43 = math.tanh %42 : vector<2x32xf32>
    %44 = tpu.concatenate %15, %19, %23, %27, %31, %35, %39, %43 in 0 : vector<2x32xf32>, vector<2x32xf32>, vector<2x32xf32>, vector<2x32xf32>, vector<2x32xf32>, vector<2x32xf32>, vector<2x32xf32>, vector<2x32xf32> -> vector<16x32xf32>
    %cst_20 = arith.constant dense<0.000000e+00> : vector<16x1xf32>
    %45 = tpu.matmul %44, %3, %cst_20 {dimension_numbers = #tpu.dot_dimension_numbers<[1], [0], [0], [1], [0, 0, 1, 1], [], []>} : vector<16x32xf32>, vector<32x1xf32>, vector<16x1xf32> -> vector<16x1xf32>
    %46 = vector.broadcast %4 : f32 to vector<16x1xf32>
    %47 = arith.addf %45, %46 : vector<16x1xf32>
    %c0_21 = arith.constant 0 : index
    %c0_22 = arith.constant 0 : index
    %48 = vector.load %arg7[%c0_21, %c0_22] : memref<16x1xf32, #tpu.memory_space<vmem>>, vector<16x1xf32>
    tpu.vector_store %arg7[%c0_21, %c0_22], %47 {strides = array<i32>} : memref<16x1xf32, #tpu.memory_space<vmem>>, vector<16x1xf32>,
    %c0_23 = arith.constant 0 : index
    %c0_24 = arith.constant 0 : index
    %49 = vector.load %arg8[%c0_23, %c0_24] : memref<2x32xf32, #tpu.memory_space<vmem>>, vector<2x32xf32>
    tpu.vector_store %arg8[%c0_23, %c0_24], %43 {strides = array<i32>} : memref<2x32xf32, #tpu.memory_space<vmem>>, vector<2x32xf32>,
    return
  }
}

</mosaic_0001>

<bundles_post_ra>
// kernel: tpu_custom_call.1
= control target key start
LH: loop header
LB: loop body
LE: loop exit
PB: predicated region body
PF: predicated region fallthrough
CT: control target
= control target key end

     0   :  { %v1067_v3 = vmov 0.0|0.0   ;;  %vm1068_vm0 = vmmov 0   ;;  %v1069_v6 = vmov 0.0   ;;  %v1070_v8 = vmov 0   ;;  %s1251_s0 = inlined_call_operand.vmem [shape: f32[16,1], index: 0, kind: input, shape index: {}]   ;;  %s1252_s1 = inlined_call_operand.vmem [shape: f32[2,32], index: 1, kind: input, shape index: {}]   ;;  %s1253_s2 = inlined_call_operand.vmem [shape: f32[1,32], index: 2, kind: input, shape index: {}]   ;;  %s1254_s3 = inlined_call_operand.vmem [shape: f32[32,32], index: 3, kind: input, shape index: {}]   ;;  %s1255_s4 = inlined_call_operand.vmem [shape: f32[1,32], index: 4, kind: input, shape index: {}]   ;;  %s1256_s5 = inlined_call_operand.vmem [shape: f32[32,1], index: 5, kind: input, shape index: {}]   ;;  %s1257_s6 = inlined_call_operand.<no memory space> [shape: f32[1,1], index: 6, kind: input, shape index: {}]   ;;  %s1258_s7 = inlined_call_operand.vmem [shape: f32[16,1], index: 7, kind: output, shape index: {0}]   ;;  %s1259_s8 = inlined_call_operand.hbm [shape: f32[2,32], index: 8, kind: output, shape index: {1}]  }
   0x1   :  { %v32_v0 = vld [vmem:[%s1254_s3] sm:$0xff]  ;;  %v33_v1 = vld [vmem:[%s1254_s3 + $0x8] sm:$0xff]  ;;  %v34_v2 = vld [vmem:[%s1254_s3 + $0x10] sm:$0xff]  ;;  %965 = vmatprep.subr.bf16.mxu0 %v1067_v3  ;;  %874 = vmatprep.mubr.msk.f32.mxu0 %vm1068_vm0, %v1069_v6 }
   0x2   :  { %v1127_v4 = vpack.c.bf16 %v33_v1, %v32_v0  ;;  %v35_v5 = vld [vmem:[%s1254_s3 + $0x18] sm:$0xff]  ;;  %v41_v7 = vld [vmem:[%s1251_s0] sm:$0xff]  ;;  %1026 = vset.pattern.permute.xlu0 %v1070_v8  ;;  %971 = vmatprep.subr.bf16.mxu1 %v1067_v3 }
   0x3   :  { %v1139_v9 = vpack.c.bf16 %v35_v5, %v34_v2  ;;  %45 = vperm.xlu0 %1026, %v41_v7  }
   0x4   :  { %967 = vmatpush3.bf16.msra.mxu0 %v1127_v4 }
   0x5   :  { %15 = vsyncpa [#allocation4], 0  ;;  %968 = vmatprep.subr.bf16.mxu0 %v1067_v3  ;;  %v42_v10 = vld [vmem:[%s1251_s0 + $0x8] sm:$0xff]  ;;  %973 = vmatpush3.bf16.msra.mxu1 %v1127_v4  ;;  %v69_v11 = vld [vmem:[%s1252_s1] sm:$0x3]  ;;  %vm70_vm1 = vcmask 261120  }
   0x6   :  { %974 = vmatprep.subr.bf16.mxu1 %v1067_v3  ;;  %885 = vmatprep.mubr.msk.f32.mxu1 %vm1068_vm0, %v1069_v6  ;;  %v808_v13 = vld [vmem:[%s1253_s2] ss:$0 sm:$0xff]  ;;  %vm694_vm2 = vcmask 1041408   ;;  %vm696_vm3 = vcmask 1043456   ;;  %vm698_vm4 = vcmask 1045504   ;;  %v37_v0 = vld [vmem:[%s1256_s5 + $0x8] sm:$0xff] }
   0x7   :  { %50 = vperm.xlu0 %1026, %v42_v10   ;;  %v809_v14 = vld [vmem:[%s1255_s4] ss:$0 sm:$0xff]  ;;  %v38_v1 = vld [vmem:[%s1256_s5 + $0x10] sm:$0xff]  ;;  %vm788_vm5 = vcmask 261126   ;;  %s1071_s26 = smov [#allocation3]  }
   0x8   :  { %970 = vmatpush3.bf16.msra.mxu0 %v1139_v9  ;;  %v36_v63 = vld [vmem:[%s1256_s5] sm:$0xff] }
   0x9   :  { %976 = vmatpush3.bf16.msra.mxu1 %v1139_v9  ;;  %977 = vmatprep.subr.bf16.mxu0 %v1067_v3  ;;  %v1013_v2 = vpack.c.bf16 %v37_v0, %v36_v63 }
   0xa   :  { %983 = vmatprep.subr.bf16.mxu1 %v1067_v3 }
   0xb   :  { %875 = vmatmul.mubr.msk.f32.vlgmr.msra.gmra.mrb[0].mxu0 %vm70_vm1, %v69_v11 }
   0xc   :  { %979 = vmatpush3.bf16.msra.mxu0 %v1127_v4  ;;  %896 = vmatprep.mubr.msk.f32.mxu0 %vm1068_vm0, %v1069_v6 }
   0xd   :  { %980 = vmatprep.subr.bf16.mxu0 %v1067_v3 }
  0x10   :  { %982 = vmatpush3.bf16.msra.mxu0 %v1139_v9 }
  0x11   :  { %989 = vmatprep.subr.bf16.mxu0 %v1067_v3 }
  0x82   :  { %v46_v12 = vpop.permute.xlu0 %45 }
  0x83   :  { %v59_v18 = vmul.f32 %v808_v13, %v46_v12 }
  0x85   :  { %v67_v19 = vadd.f32 %v809_v14, %v59_v18 }
  0x86   :  { %v51_v15 = vpop.permute.xlu0 %50 }
  0x87   :  { %v60_v16 = vmul.f32 %v808_v13, %v51_v15 }
  0x89   :  { %v1169_v17 = vadd.f32 %v809_v14, %v60_v16 }
  0xde   :  { %v140_v20 = vpop.f32.mrb[0].mxu0 }
  0xdf   :  { %v144_v21 = vadd.f32 %v140_v20, %v67_v19  ;;  %v876_v22 = vpop.f32.mrb[1].mxu0 }
  0xe1   :  { %1027 = vtanh.f32 %v144_v21 }
  0xeb   :  { %v1028_v23 = vpop.eup %1027 }
  0xec   :  { %886 = vmatmul.mubr.msk.f32.vlgmr.msra.gmra.mrb[0].mxu1 %vm70_vm1, %v1028_v23 }
  0xed   :  { %985 = vmatpush3.bf16.msra.mxu1 %v1127_v4  ;;  %907 = vmatprep.mubr.msk.f32.mxu1 %vm1068_vm0, %v1069_v6 }
  0xee   :  { %986 = vmatprep.subr.bf16.mxu1 %v1067_v3 }
  0xf1   :  { %988 = vmatpush3.bf16.msra.mxu1 %v1139_v9 }
  0xf2   :  { %995 = vmatprep.subr.bf16.mxu1 %v1067_v3 }
 0x1bf   :  { %v215_v24 = vpop.f32.mrb[0].mxu1 }
 0x1c0   :  { %v220_v25 = vrot.slane %v215_v24, 6  ;;  %v887_v26 = vpop.f32.mrb[1].mxu1 }
 0x1c2   :  { %v222_v27 = vadd.f32 %v220_v25, %v67_v19 }
 0x1c4   :  { %1029 = vtanh.f32 %v222_v27 }
 0x1ce   :  { %v1030_v28 = vpop.eup %1029 }
 0x1cf   :  { %v225_v29 = vrot.slane %v1030_v28, 2  ;;  %v695_v35 = vsel %vm694_vm2, %v1028_v23, %v1030_v28 }
 0x1d1   :  { %897 = vmatmul.mubr.msk.f32.vlgmr.msra.gmra.mrb[2].mxu0 %vm70_vm1, %v225_v29 }
 0x1d2   :  { %991 = vmatpush3.bf16.msra.mxu0 %v1127_v4  ;;  %918 = vmatprep.mubr.msk.f32.mxu0 %vm1068_vm0, %v1069_v6 }
 0x1d3   :  { %992 = vmatprep.subr.bf16.mxu0 %v1067_v3 }
 0x1d6   :  { %994 = vmatpush3.bf16.msra.mxu0 %v1139_v9 }
 0x1d7   :  { %1001 = vmatprep.subr.bf16.mxu0 %v1067_v3 }
 0x2a4   :  { %v294_v30 = vpop.f32.mrb[2].mxu0 }
 0x2a5   :  { %v299_v31 = vrot.slane %v294_v30, 4  ;;  %v898_v32 = vpop.f32.mrb[3].mxu0 }
 0x2a7   :  { %v301_v33 = vadd.f32 %v299_v31, %v67_v19 }
 0x2a9   :  { %1031 = vtanh.f32 %v301_v33 }
 0x2b3   :  { %v1032_v34 = vpop.eup %1031 }
 0x2b4   :  { %v304_v36 = vrot.slane %v1032_v34, 4  ;;  %v697_v37 = vsel %vm696_vm3, %v695_v35, %v1032_v34 }
 0x2b6   :  { %908 = vmatmul.mubr.msk.f32.vlgmr.msra.gmra.mrb[2].mxu1 %vm70_vm1, %v304_v36 }
 0x2b7   :  { %997 = vmatpush3.bf16.msra.mxu1 %v1127_v4  ;;  %929 = vmatprep.mubr.msk.f32.mxu1 %vm1068_vm0, %v1069_v6 }
 0x2b8   :  { %998 = vmatprep.subr.bf16.mxu1 %v1067_v3 }
 0x2bb   :  { %1000 = vmatpush3.bf16.msra.mxu1 %v1139_v9 }
 0x2bc   :  { %1007 = vmatprep.subr.bf16.mxu1 %v1067_v3 }
 0x389   :  { %v373_v38 = vpop.f32.mrb[2].mxu1 }
 0x38a   :  { %v378_v39 = vrot.slane %v373_v38, 2  ;;  %v909_v40 = vpop.f32.mrb[3].mxu1 }
 0x38c   :  { %v380_v41 = vadd.f32 %v378_v39, %v67_v19 }
 0x38e   :  { %1033 = vtanh.f32 %v380_v41 }
 0x398   :  { %v1034_v42 = vpop.eup %1033 }
 0x399   :  { %v383_v43 = vrot.slane %v1034_v42, 6  ;;  %v699_v44 = vsel %vm698_vm4, %v697_v37, %v1034_v42 }
 0x39b   :  { %919 = vmatmul.mubr.msk.f32.vlgmr.msra.gmra.mrb[4].mxu0 %vm70_vm1, %v383_v43 }
 0x39c   :  { %1003 = vmatpush3.bf16.msra.mxu0 %v1127_v4  ;;  %940 = vmatprep.mubr.msk.f32.mxu0 %vm1068_vm0, %v1069_v6 }
 0x39d   :  { %1004 = vmatprep.subr.bf16.mxu0 %v1067_v3 }
 0x3a0   :  { %1006 = vmatpush3.bf16.msra.mxu0 %v1139_v9 }
 0x3a1   :  { %1014 = vmatprep.subr.bf16.mxu0 %v1013_v2 }
 0x46e   :  { %v452_v45 = vpop.f32.mrb[4].mxu0 }
 0x46f   :  { %v456_v46 = vadd.f32 %v452_v45, %v1169_v17  ;;  %v920_v47 = vpop.f32.mrb[5].mxu0 }
 0x471   :  { %1035 = vtanh.f32 %v456_v46 }
 0x47b   :  { %v1036_v48 = vpop.eup %1035 }
 0x47c   :  { %930 = vmatmul.mubr.msk.f32.vlgmr.msra.gmra.mrb[4].mxu1 %vm70_vm1, %v1036_v48 }
 0x47d   :  { %1009 = vmatpush3.bf16.msra.mxu1 %v1127_v4  ;;  %951 = vmatprep.mubr.msk.f32.mxu1 %vm1068_vm0, %v1069_v6 }
 0x47e   :  { %1010 = vmatprep.subr.bf16.mxu1 %v1067_v3  ;;  %v39_v3 = vld [vmem:[%s1256_s5 + $0x18] sm:$0xff]  ;;  %s798_s5 = sshll.u32 %s1071_s26, 4  ;;  %s799_s5 = int_to_ptr.vmem [resolvable:$true] %s798_s5 }
 0x47f   :  { %v1017_v4 = vpack.c.bf16 %v39_v3, %v38_v1  ;;  %s1043_s27 = scalar_lea.vmem %s799_s5, 32  ;;  %p1048_p1 = scmp.lt.s32.totalorder %s799_s5, %s799_s5 }
 0x480   :  { %p1044_p0 = scmp.ne.s32.totalorder %s799_s5, %s1043_s27  ;;  %p1049_p2 = scmp.lt.s32.totalorder %s1043_s27, %s1043_s27 }
 0x481   :  { %1012 = vmatpush3.bf16.msra.mxu1 %v1139_v9 }
 0x482   :  { %p1050_p3 = por %p1049_p2, %p1048_p1 }
 0x484   :  { %p1051_p4 = pnand %p1050_p3, %p1044_p0 }
 0x54f   :  { %v527_v49 = vpop.f32.mrb[4].mxu1 }
 0x550   :  { %v532_v50 = vrot.slane %v527_v49, 6  ;;  %v931_v51 = vpop.f32.mrb[5].mxu1 }
 0x552   :  { %v534_v52 = vadd.f32 %v532_v50, %v1169_v17 }
 0x554   :  { %1037 = vtanh.f32 %v534_v52 }
 0x55e   :  { %v1038_v53 = vpop.eup %1037 }
 0x55f   :  { %v537_v54 = vrot.slane %v1038_v53, 2  ;;  %v700_v60 = vsel %vm694_vm2, %v1036_v48, %v1038_v53 }
 0x561   :  { %941 = vmatmul.mubr.msk.f32.vlgmr.msra.gmra.mrb[6].mxu0 %vm70_vm1, %v537_v54 }
 0x562   :  { %962 = vmatprep.mubr.msk.f32.mxu0 %vm70_vm1, %v699_v44  ;;  %1016 = vmatpush3.bf16.msra.mxu0 %v1013_v2 }
 0x563   :  { %1018 = vmatprep.subr.bf16.mxu0 %v1017_v4 }
 0x566   :  { %1020 = vmatpush3.bf16.msra.mxu0 %v1017_v4 }
 0x634   :  { %v606_v55 = vpop.f32.mrb[6].mxu0 }
 0x635   :  { %v611_v56 = vrot.slane %v606_v55, 4  ;;  %v942_v57 = vpop.f32.mrb[7].mxu0 }
 0x637   :  { %v613_v58 = vadd.f32 %v611_v56, %v1169_v17 }
 0x639   :  { %1039 = vtanh.f32 %v613_v58 }
 0x643   :  { %v1040_v59 = vpop.eup %1039 }
 0x644   :  { %v616_v61 = vrot.slane %v1040_v59, 4  ;;  %v701_v62 = vsel %vm696_vm3, %v700_v60, %v1040_v59 }
 0x646   :  { %952 = vmatmul.mubr.msk.f32.vlgmr.msra.gmra.mrb[6].mxu1 %vm70_vm1, %v616_v61 }
 0x719   :  { %v685_v5 = vpop.f32.mrb[6].mxu1 }
 0x71a   :  { %v690_v6 = vrot.slane %v685_v5, 2  ;;  %v953_v7 = vpop.f32.mrb[7].mxu1 }
 0x71c   :  { %v692_v8 = vadd.f32 %v690_v6, %v1169_v17 }
 0x71e   :  { %1041 = vtanh.f32 %v692_v8 }
 0x728   :  { %v1042_v9 = vpop.eup %1041 }
 0x729   :  { %v702_v10 = vsel %vm698_vm4, %v701_v62, %v1042_v9  ;;  %789 = vst.msk [vmem:[#allocation3 - $0x6] sm:$0xc0] %vm788_vm5, %v1042_v9 }
 0x72a   :  { %963 = vmatmul.mubr.msk.f32.vlgmr.msra.gmra.mrb[8].mxu0 %vm70_vm1, %v702_v10 }
 0x72b   :  { %1054 = shalt.err (!%p1051_p4)
}
 0x72c   :  { %s1055_s30 = scalar_lea.hbm %s1259_s8, 32 }
 0x72d   :  { %p1056_p5 = scmp.ne.s32.totalorder %s1259_s8, %s1055_s30  ;;  %p1059_p6 = scmp.lt.u32.totalorder %s1055_s30, %s1259_s8 }
 0x72f   :  { %p1061_p7 = pnand %p1059_p6, %p1056_p5 }
 0x731   :  { %1064 = shalt.err (!%p1061_p7)
}
 0x732   :  { %801 = dma.vmem_to_hbm [thread:$0]  %s799_s5, 32, %s1259_s8, [#allocation4]   ;;  %v703_v11 = vstv %s1257_s6  ;;  %vm785_vm6 = vcmask 7168  }
 0x7fd   :  { %v964_v12 = vpop.f32.mrb[8].mxu0 }
 0x7fe   :  { %v782_v13 = vadd.f32 %v964_v12, %v703_v11  ;;  %v776_v14 = vpop.f32.mrb[9].mxu0 }
 0x7ff   :  { %v777_v15 = vadd.f32 %v776_v14, %v703_v11 }
 0x800   :  { %787 = vst.msk [vmem:[%s1258_s7 + $0x8] sm:$0xff] %vm785_vm6, %v782_v13 }
 0x801   :  { %786 = vst.msk [vmem:[%s1258_s7] sm:$0xff] %vm785_vm6, %v777_v15 }
 0x802   :  { %1065 = dma.done.wait [#allocation4], 32  }
 0x803   :  { %1066 = vsyncadd [#allocation4], 4294967264 }
 0x804   :  { %807 = vsyncpa [#allocation4], 1 }

</bundles_post_ra>
